<compile_context>
chip_gen: v7x
topology: tpu7x:2x2x1
jax: 0.10.0
libtpu: 0.0.40
codegen_flags: <defaults>
</compile_context>

<pallas_src>
import jax
import jax.numpy as jnp
import numpy as np
from jax.experimental import pallas as pl
from jax.experimental.pallas import tpu as pltpu


def _hyper_gnn_kernel(a_ref, w_ref, x1_ref,
                      we1_ref, be1_ref, we2_ref, be2_ref,
                      w_new_ref, x_new_ref):
    """One (batch-tile, row-tile) block per grid step (order-2 forward_dense)."""
    bt, nr, n = a_ref.shape                   # rows i are tiled, columns j full
    ce = w_ref.shape[-1]
    co = x1_ref.shape[-1]
    cdt = w_ref.dtype                         # matmul operand dtype (f32 / bf16)

    # ---- adjacency row-normalization (norm=True; zero-sum rows -> 0) -------
    a = a_ref[...].astype(jnp.float32)                        # (bt, nr, n)
    a_sum = jnp.sum(a, axis=-1, keepdims=True)                # (bt, nr, 1)
    inv = jnp.where(a_sum == 0.0, 0.0, 1.0 / a_sum)
    a_norm = a * inv

    # ---- e_func: ONE flattened (bt*nr*n, ce) matmul chain ------------------
    # PyTorch computes e_func(cat(W, zeros_like(W1), -1)); the zero half of the
    # concat contributes nothing, so we matmul against only the first Ce rows
    # of e_func.0's weight (pre-sliced in the wrapper) -- identical math.
    w2d = w_ref[...].reshape(bt * nr * n, ce)
    he = jnp.maximum(
        jnp.dot(w2d, we1_ref[...], preferred_element_type=jnp.float32)
        + be1_ref[...], 0.0)
    w_new = jnp.maximum(
        jnp.dot(he.astype(cdt), we2_ref[...], preferred_element_type=jnp.float32)
        + be2_ref[...], 0.0)                                   # (bt*nr*n, co) f32

    # W_new writeback in the output dtype (bf16 in the bf16 path -> ~40% fewer
    # HBM bytes on this bandwidth-bound kernel).
    w_new_ref[...] = w_new.reshape(bt, nr * n, co).astype(w_new_ref.dtype)

    # ---- fused aggregation --------------------------------------------------
    # x_new[b,i,f] = sum_j a_norm[b,i,j] * W_new[b,i,j,f] * x1[b,j,f]
    x1 = x1_ref[...].astype(jnp.float32).reshape(bt, 1, n, co)
    x_new = jnp.sum(w_new.reshape(bt, nr, n, co) * (a_norm[..., None] * x1),
                    axis=2)                                     # (bt, nr, co)
    x_new_ref[...] = x_new.astype(x_new_ref.dtype)


def _vmem_capacity_bytes():
    """Physical VMEM per TensorCore (v5e/v6e 128 MiB, v7x 64 MiB), queried."""
    try:
        cap = getattr(pltpu.get_tpu_info(), "vmem_capacity_bytes", None)
        if cap:
            return int(cap)
    except Exception:
        pass
    return 128 << 20


def _step_vmem_bytes(bt, nr, N, Ce, Co, in_it, out_it):
    """Full per-step footprint: double-buffered blocks + f32 intermediates."""
    f32 = 4
    blocks = (bt * nr * N * Ce * in_it        # W block (in)
              + bt * nr * N * in_it           # A block (in)
              + bt * N * Co * in_it           # x1 block (in)
              + bt * nr * N * Co * out_it     # W_new block (out)
              + bt * nr * Co * f32)           # x_new block (out)
    interm = 3 * bt * nr * N * Co * f32       # he, W_new (f32), fused product
    return 2 * blocks + interm                # 2x: Pallas double buffering


def _choose_tiles(B, N, Ce, Co, in_it, out_it, budget_bytes):
    """Largest (batch_tile, row_tile) whose full per-step footprint fits the
    budget, then forced to yield >= 2 grid steps (feed both v7x TensorCores)."""
    nr_cands = [N] + sorted((d for d in range(8, N, 8) if N % d == 0),
                            reverse=True)
    bt_cands = [d for d in range(B, 0, -1) if B % d == 0]

    choice = None
    for bt in bt_cands:
        for nr in nr_cands:
            if _step_vmem_bytes(bt, nr, N, Ce, Co, in_it, out_it) <= budget_bytes:
                choice = (bt, nr)
                break
        if choice is not None:
            break
    if choice is None:
        choice = (1, nr_cands[-1])
    bt, nr = choice

    # Megacore: guarantee at least two parallel grid steps when possible.
    if (B // bt) * (N // nr) < 2:
        smaller_bt = [d for d in bt_cands if d < bt]
        if smaller_bt:
            bt = smaller_bt[0]
    if (B // bt) * (N // nr) < 2:
        smaller_nr = [d for d in nr_cands if d < nr]
        if smaller_nr:
            nr = smaller_nr[0]
    return bt, nr


def hyper_gnn_dense(A, W, x, params, *, compute_dtype=jnp.float32):
    """Pallas implementation of HyperGNNLayer.forward_dense (order=2, norm=True).

    Assumes non-negative (0/1) adjacency.  In the bf16 path W_new is returned
    in bfloat16 (it is the dominant HBM stream); x_new is always float32.
    """
    B, N, _ = A.shape
    Ce = W.shape[-1]
    Co = params["we2"].shape[-1]
    cdt = jnp.dtype(compute_dtype)
    w_out_dtype = cdt                      # emit W_new in compute dtype

    # ---- n_func hoisted out of the kernel (tiny (B*N, Cn) GEMM in plain XLA)
    h1 = jax.nn.relu(x.astype(jnp.float32) @ params["wn1"] + params["bn1"][0])
    x1 = jax.nn.relu(h1 @ params["wn2"] + params["bn2"][0])     # (B, N, Co) f32

    # Big HBM movers / matmul operands in compute_dtype; biases stay f32.
    Wf = W.reshape(B, N * N, Ce).astype(cdt)   # contiguous edge slab
    Af = A.astype(cdt)                         # narrow A stream, upcast in-kernel
    x1c = x1.astype(cdt)
    we1 = params["we1"][:Ce, :].astype(cdt)    # drop rows hitting the zero concat
    we2 = params["we2"].astype(cdt)
    be1 = params["be1"].astype(jnp.float32)
    be2 = params["be2"].astype(jnp.float32)

    in_it = cdt.itemsize
    out_it = jnp.dtype(w_out_dtype).itemsize
    cap = _vmem_capacity_bytes()
    cap_limit = cap - max(8 << 20, cap // 8)   # headroom below physical VMEM
    bt, nr = _choose_tiles(B, N, Ce, Co, in_it, out_it,
                           budget_bytes=cap_limit - (6 << 20))
    grid = (B // bt, N // nr)

    resident = 2 * ((Ce * Co + Co * Co) * in_it + 2 * Co * 4)   # MLP weights/biases
    est = (_step_vmem_bytes(bt, nr, N, Ce, Co, in_it, out_it)
           + resident + (6 << 20))
    vmem_limit = int(min(max(est, 24 << 20), cap_limit))

    def const_spec(arr):
        return pl.BlockSpec(arr.shape, lambda b, r, _nd=arr.ndim: (0,) * _nd)

    grid_spec = pltpu.PrefetchScalarGridSpec(
        num_scalar_prefetch=0,
        grid=grid,
        in_specs=[
            pl.BlockSpec((bt, nr, N), lambda b, r: (b, r, 0)),        # A (row tile)
            pl.BlockSpec((bt, nr * N, Ce), lambda b, r: (b, r, 0)),   # W (row tile)
            pl.BlockSpec((bt, N, Co), lambda b, r: (b, 0, 0)),        # x1 (all nodes)
            const_spec(we1), const_spec(be1), const_spec(we2), const_spec(be2),
        ],
        out_specs=[
            pl.BlockSpec((bt, nr * N, Co), lambda b, r: (b, r, 0)),   # W_new
            pl.BlockSpec((bt, nr, Co), lambda b, r: (b, r, 0)),       # x_new
        ],
    )

    w_new_flat, x_new = pl.pallas_call(
        _hyper_gnn_kernel,
        out_shape=(jax.ShapeDtypeStruct((B, N * N, Co), w_out_dtype),
                   jax.ShapeDtypeStruct((B, N, Co), jnp.float32)),
        grid_spec=grid_spec,
        compiler_params=pltpu.CompilerParams(
            dimension_semantics=("parallel", "parallel"),
            vmem_limit_bytes=vmem_limit),
    )(Af, Wf, x1c, we1, be1, we2, be2)

    # Free (contiguous) reshape back to the PyTorch (B, N, N, Co) layout.
    return w_new_flat.reshape(B, N, N, Co), x_new


def hyper_gnn_layer_forward(A, W, x, params, *, compute_dtype=jnp.float32):
    """Mirrors HyperGNNLayer.forward with sk_channel=False (classifier is None)."""
    if not isinstance(A, (list, tuple)):
        A, W = [A], [W]
    W_new_list = []
    x2 = None
    for _A, _W in zip(A, W):
        w_new, x_new = hyper_gnn_dense(_A, _W, x, params,
                                       compute_dtype=compute_dtype)
        x2 = x_new if x2 is None else x2 + x_new
        W_new_list.append(w_new)
    return W_new_list, x2


def init_params(key, in_nfeat, in_efeat, out_feat):
    """Deterministic nn.Linear-style init (uniform(+-1/sqrt(fan_in)))."""
    def linear(k, fan_in, fan_out):
        kw, kb = jax.random.split(k)
        bound = 1.0 / float(np.sqrt(fan_in))
        w = jax.random.uniform(kw, (fan_in, fan_out), jnp.float32, -bound, bound)
        b = jax.random.uniform(kb, (1, fan_out), jnp.float32, -bound, bound)
        return w, b

    k = jax.random.split(key, 4)
    we1, be1 = linear(k[0], in_efeat + in_nfeat, out_feat)   # e_func.0
    we2, be2 = linear(k[1], out_feat, out_feat)              # e_func.2
    wn1, bn1 = linear(k[2], in_nfeat, out_feat)              # n_func.0
    wn2, bn2 = linear(k[3], out_feat, out_feat)              # n_func.2
    return dict(we1=we1, be1=be1, we2=we2, be2=be2,
                wn1=wn1, bn1=bn1, wn2=wn2, bn2=bn2)


def reference_forward_dense(A, W, x, params):
    """Pure-JAX transcription of HyperGNNLayer.forward_dense (order=2)."""
    Cn = x.shape[-1]
    zeros = jnp.zeros(W.shape[:-1] + (Cn,), W.dtype)          # zeros_like(W1)
    e_in = jnp.concatenate([W, zeros], axis=-1)
    h = jax.nn.relu(e_in @ params["we1"] + params["be1"][0])
    W_new = jax.nn.relu(h @ params["we2"] + params["be2"][0])

    A_sum = jnp.sum(A, axis=2, keepdims=True)
    A_n = A / A_sum
    A_n = jnp.where(jnp.isnan(A_n), 0.0, A_n)

    h1 = jax.nn.relu(x @ params["wn1"] + params["bn1"][0])
    x1 = jax.nn.relu(h1 @ params["wn2"] + params["bn2"][0])

    x_new = jnp.sum(A_n[..., None] * W_new * x1[:, None, :, :], axis=2)
    return W_new, x_new


if __name__ == "__main__":
    B, N = 2, 16
    in_nfeat, in_efeat = 32, 16
    out_feat = 32   # out_node_features == out_edge_features (sk_channel=False)

    key = jax.random.PRNGKey(0)
    kA, kW, kx, kp = jax.random.split(key, 4)
    A = (jax.random.uniform(kA, (B, N, N)) > 0.5).astype(jnp.float32)
    W = jax.random.normal(kW, (B, N, N, in_efeat), jnp.float32)
    x = jax.random.normal(kx, (B, N, in_nfeat), jnp.float32)
    params = init_params(kp, in_nfeat, in_efeat, out_feat)

    W_ref, x_ref = reference_forward_dense(A, W, x, params)

    # ---- f32 path (tight correctness check) --------------------------------
    W_new_list, x_new = hyper_gnn_layer_forward(A, W, x, params)
    jax.block_until_ready((W_new_list, x_new))
    np.testing.assert_allclose(np.asarray(W_new_list[0]), np.asarray(W_ref),
                               rtol=1e-5, atol=1e-5)
    np.testing.assert_allclose(np.asarray(x_new), np.asarray(x_ref),
                               rtol=1e-5, atol=1e-5)

    # ---- bf16 path (halves W in-stream, halves W_new out-stream; f32 acc) --
    W_new_bf, x_new_bf = hyper_gnn_dense(A, W, x, params,
                                         compute_dtype=jnp.bfloat16)
    jax.block_until_ready((W_new_bf, x_new_bf))
    np.testing.assert_allclose(np.asarray(W_new_bf.astype(jnp.float32)),
                               np.asarray(W_ref), rtol=5e-2, atol=5e-2)
    np.testing.assert_allclose(np.asarray(x_new_bf), np.asarray(x_ref),
                               rtol=5e-2, atol=5e-2)

    print("KERNEL_OK")
</pallas_src>

<mosaic_0001>
module attributes {stable_mosaic.version = 11 : i64} {
  func.func @_hyper_gnn_kernel(%arg0: i32, %arg1: i32, %arg2: memref<1x16x16xf32, #tpu.memory_space<vmem>>, %arg3: memref<1x256x16xf32, #tpu.memory_space<vmem>>, %arg4: memref<1x16x32xf32, #tpu.memory_space<vmem>>, %arg5: memref<16x32xf32, #tpu.memory_space<vmem>>, %arg6: memref<1x32xf32, #tpu.memory_space<vmem>>, %arg7: memref<32x32xf32, #tpu.memory_space<vmem>>, %arg8: memref<1x32xf32, #tpu.memory_space<vmem>>, %arg9: memref<1x256x32xf32, #tpu.memory_space<vmem>>, %arg10: memref<1x16x32xf32, #tpu.memory_space<vmem>>) attributes {dimension_semantics = [#tpu.dimension_semantics<parallel>, #tpu.dimension_semantics<parallel>], iteration_bounds = array<i64: 2, 1>, scalar_prefetch = 0 : i64, scratch_operands = 0 : i64, tpu.core_type = #tpu.core_type<tc>, window_params = [{transform_indices = @transform_0, window_bounds = array<i64: 1, 16, 16>}, {transform_indices = @transform_1, window_bounds = array<i64: 1, 256, 16>}, {transform_indices = @transform_2, window_bounds = array<i64: 1, 16, 32>}, {pipeline_mode = #tpu.pipeline_mode<synchronous>, transform_indices = @transform_3, window_bounds = array<i64: 16, 32>}, {pipeline_mode = #tpu.pipeline_mode<synchronous>, transform_indices = @transform_4, window_bounds = array<i64: 1, 32>}, {pipeline_mode = #tpu.pipeline_mode<synchronous>, transform_indices = @transform_5, window_bounds = array<i64: 32, 32>}, {pipeline_mode = #tpu.pipeline_mode<synchronous>, transform_indices = @transform_6, window_bounds = array<i64: 1, 32>}, {transform_indices = @transform_7, window_bounds = array<i64: 1, 256, 32>}, {transform_indices = @transform_8, window_bounds = array<i64: 1, 16, 32>}]} {
    %c0 = arith.constant 0 : index
    %c0_0 = arith.constant 0 : index
    %c0_1 = arith.constant 0 : index
    %0 = vector.load %arg2[%c0, %c0_0, %c0_1] : memref<1x16x16xf32, #tpu.memory_space<vmem>>, vector<1x16x16xf32>
    %cst = arith.constant dense<0.000000e+00> : vector<1x16xf32>
    %1 = vector.multi_reduction <add>, %0, %cst [2] : vector<1x16x16xf32> to vector<1x16xf32>
    %2 = vector.shape_cast %1 : vector<1x16xf32> to vector<1x16x1xf32>
    %cst_2 = arith.constant 0.000000e+00 : f32
    %3 = vector.broadcast %cst_2 : f32 to vector<1x16x1xf32>
    %4 = arith.cmpf oeq, %2, %3 : vector<1x16x1xf32>
    %cst_3 = arith.constant 1.000000e+00 : f32
    %5 = vector.broadcast %cst_3 : f32 to vector<1x16x1xf32>
    %6 = arith.divf %5, %2 : vector<1x16x1xf32>
    %cst_4 = arith.constant 0.000000e+00 : f32
    %7 = vector.broadcast %cst_4 : f32 to vector<1x16x1xf32>
    %8 = arith.select %4, %7, %6 : vector<1x16x1xi1>, vector<1x16x1xf32>
    %9 = vector.broadcast %8 : vector<1x16x1xf32> to vector<1x16x16xf32>
    %10 = arith.mulf %0, %9 : vector<1x16x16xf32>
    %c0_5 = arith.constant 0 : index
    %c0_6 = arith.constant 0 : index
    %c0_7 = arith.constant 0 : index
    %11 = vector.load %arg3[%c0_5, %c0_6, %c0_7] : memref<1x256x16xf32, #tpu.memory_space<vmem>>, vector<1x256x16xf32>
    %12 = vector.shape_cast %11 : vector<1x256x16xf32> to vector<256x16xf32>
    %c0_8 = arith.constant 0 : index
    %c0_9 = arith.constant 0 : index
    %13 = vector.load %arg5[%c0_8, %c0_9] : memref<16x32xf32, #tpu.memory_space<vmem>>, vector<16x32xf32>
    %cst_10 = arith.constant dense<0.000000e+00> : vector<256x32xf32>
    %14 = tpu.matmul %12, %13, %cst_10 {dimension_numbers = #tpu.dot_dimension_numbers<[1], [0], [0], [1], [0, 0, 1, 1], [], []>} : vector<256x16xf32>, vector<16x32xf32>, vector<256x32xf32> -> vector<256x32xf32>
    %c0_11 = arith.constant 0 : index
    %c0_12 = arith.constant 0 : index
    %15 = vector.load %arg6[%c0_11, %c0_12] : memref<1x32xf32, #tpu.memory_space<vmem>>, vector<1x32xf32>
    %16 = vector.broadcast %15 : vector<1x32xf32> to vector<256x32xf32>
    %17 = arith.addf %14, %16 : vector<256x32xf32>
    %cst_13 = arith.constant 0.000000e+00 : f32
    %18 = vector.broadcast %cst_13 : f32 to vector<256x32xf32>
    %19 = arith.maximumf %17, %18 : vector<256x32xf32>
    %c0_14 = arith.constant 0 : index
    %c0_15 = arith.constant 0 : index
    %20 = vector.load %arg7[%c0_14, %c0_15] : memref<32x32xf32, #tpu.memory_space<vmem>>, vector<32x32xf32>
    %cst_16 = arith.constant dense<0.000000e+00> : vector<256x32xf32>
    %21 = tpu.matmul %19, %20, %cst_16 {dimension_numbers = #tpu.dot_dimension_numbers<[1], [0], [0], [1], [0, 0, 1, 1], [], []>} : vector<256x32xf32>, vector<32x32xf32>, vector<256x32xf32> -> vector<256x32xf32>
    %c0_17 = arith.constant 0 : index
    %c0_18 = arith.constant 0 : index
    %22 = vector.load %arg8[%c0_17, %c0_18] : memref<1x32xf32, #tpu.memory_space<vmem>>, vector<1x32xf32>
    %23 = vector.broadcast %22 : vector<1x32xf32> to vector<256x32xf32>
    %24 = arith.addf %21, %23 : vector<256x32xf32>
    %cst_19 = arith.constant 0.000000e+00 : f32
    %25 = vector.broadcast %cst_19 : f32 to vector<256x32xf32>
    %26 = arith.maximumf %24, %25 : vector<256x32xf32>
    %27 = vector.shape_cast %26 : vector<256x32xf32> to vector<1x256x32xf32>
    %c0_20 = arith.constant 0 : index
    %c0_21 = arith.constant 0 : index
    %c0_22 = arith.constant 0 : index
    %28 = vector.load %arg9[%c0_20, %c0_21, %c0_22] : memref<1x256x32xf32, #tpu.memory_space<vmem>>, vector<1x256x32xf32>
    tpu.vector_store %arg9[%c0_20, %c0_21, %c0_22], %27 {strides = array<i32>} : memref<1x256x32xf32, #tpu.memory_space<vmem>>, vector<1x256x32xf32>,
    %c0_23 = arith.constant 0 : index
    %c0_24 = arith.constant 0 : index
    %c0_25 = arith.constant 0 : index
    %29 = vector.load %arg4[%c0_23, %c0_24, %c0_25] : memref<1x16x32xf32, #tpu.memory_space<vmem>>, vector<1x16x32xf32>
    %30 = vector.shape_cast %29 : vector<1x16x32xf32> to vector<1x1x16x32xf32>
    %31 = vector.shape_cast %26 : vector<256x32xf32> to vector<1x16x16x32xf32>
    %32 = vector.shape_cast %10 : vector<1x16x16xf32> to vector<1x16x16x1xf32>
    %33 = vector.broadcast %32 : vector<1x16x16x1xf32> to vector<1x16x16x32xf32>
    %34 = vector.broadcast %30 : vector<1x1x16x32xf32> to vector<1x16x16x32xf32>
    %35 = arith.mulf %33, %34 : vector<1x16x16x32xf32>
    %36 = arith.mulf %31, %35 : vector<1x16x16x32xf32>
    %cst_26 = arith.constant dense<0.000000e+00> : vector<1x16x32xf32>
    %37 = vector.multi_reduction <add>, %36, %cst_26 [2] : vector<1x16x16x32xf32> to vector<1x16x32xf32>
    %c0_27 = arith.constant 0 : index
    %c0_28 = arith.constant 0 : index
    %c0_29 = arith.constant 0 : index
    %38 = vector.load %arg10[%c0_27, %c0_28, %c0_29] : memref<1x16x32xf32, #tpu.memory_space<vmem>>, vector<1x16x32xf32>
    tpu.vector_store %arg10[%c0_27, %c0_28, %c0_29], %37 {strides = array<i32>} : memref<1x16x32xf32, #tpu.memory_space<vmem>>, vector<1x16x32xf32>,
    return
  }
  func.func @transform_0(%arg0: i32, %arg1: i32) -> (i32, i32, i32) {
    %c0_i32 = arith.constant 0 : i32
    %c0_i32_0 = arith.constant 0 : i32
    return %arg0, %arg1, %c0_i32 : i32, i32, i32
  }
  func.func @transform_1(%arg0: i32, %arg1: i32) -> (i32, i32, i32) {
    %c0_i32 = arith.constant 0 : i32
    %c0_i32_0 = arith.constant 0 : i32
    return %arg0, %arg1, %c0_i32 : i32, i32, i32
  }
  func.func @transform_2(%arg0: i32, %arg1: i32) -> (i32, i32, i32) {
    %c0_i32 = arith.constant 0 : i32
    %c0_i32_0 = arith.constant 0 : i32
    %c0_i32_1 = arith.constant 0 : i32
    return %arg0, %c0_i32, %c0_i32_0 : i32, i32, i32
  }
  func.func @transform_3(%arg0: i32, %arg1: i32) -> (i32, i32) {
    %c0_i32 = arith.constant 0 : i32
    %c0_i32_0 = arith.constant 0 : i32
    %c0_i32_1 = arith.constant 0 : i32
    return %c0_i32, %c0_i32_0 : i32, i32
  }
  func.func @transform_4(%arg0: i32, %arg1: i32) -> (i32, i32) {
    %c0_i32 = arith.constant 0 : i32
    %c0_i32_0 = arith.constant 0 : i32
    %c0_i32_1 = arith.constant 0 : i32
    return %c0_i32, %c0_i32_0 : i32, i32
  }
  func.func @transform_5(%arg0: i32, %arg1: i32) -> (i32, i32) {
    %c0_i32 = arith.constant 0 : i32
    %c0_i32_0 = arith.constant 0 : i32
    %c0_i32_1 = arith.constant 0 : i32
    return %c0_i32, %c0_i32_0 : i32, i32
  }
  func.func @transform_6(%arg0: i32, %arg1: i32) -> (i32, i32) {
    %c0_i32 = arith.constant 0 : i32
    %c0_i32_0 = arith.constant 0 : i32
    %c0_i32_1 = arith.constant 0 : i32
    return %c0_i32, %c0_i32_0 : i32, i32
  }
  func.func @transform_7(%arg0: i32, %arg1: i32) -> (i32, i32, i32) {
    %c0_i32 = arith.constant 0 : i32
    %c0_i32_0 = arith.constant 0 : i32
    return %arg0, %arg1, %c0_i32 : i32, i32, i32
  }
  func.func @transform_8(%arg0: i32, %arg1: i32) -> (i32, i32, i32) {
    %c0_i32 = arith.constant 0 : i32
    %c0_i32_0 = arith.constant 0 : i32
    return %arg0, %arg1, %c0_i32 : i32, i32, i32
  }
}

</mosaic_0001>

<bundles_post_ra>
// kernel: tpu_custom_call.1
= control target key start
LH: loop header
LB: loop body
LE: loop exit
PB: predicated region body
PF: predicated region fallthrough
CT: control target
= control target key end

     0   :  { %14 = vsyncpa [#allocation3], 0  ;;  %s2875_s0 = inlined_call_operand.vmem [shape: f32[2,16,16], index: 0, kind: input, shape index: {}]   ;;  %s2876_s1 = inlined_call_operand.vmem [shape: f32[2,256,16], index: 1, kind: input, shape index: {}]   ;;  %s2877_s2 = inlined_call_operand.vmem [shape: f32[2,16,32], index: 2, kind: input, shape index: {}]   ;;  %s2878_s3 = inlined_call_operand.vmem [shape: f32[16,32], index: 3, kind: input, shape index: {}]   ;;  %s2879_s4 = inlined_call_operand.vmem [shape: f32[1,32], index: 4, kind: input, shape index: {}]   ;;  %s2880_s5 = inlined_call_operand.vmem [shape: f32[32,32], index: 5, kind: input, shape index: {}]   ;;  %s2881_s6 = inlined_call_operand.vmem [shape: f32[1,32], index: 6, kind: input, shape index: {}]   ;;  %s2882_s7 = inlined_call_operand.vmem [shape: f32[2,256,32], index: 7, kind: output, shape index: {0}]   ;;  %s2883_s8 = inlined_call_operand.hbm [shape: f32[2,16,32], index: 8, kind: output, shape index: {1}]  }
   0x1   :  { %16 = vsyncpa [#allocation3 + $0x1], 0  ;;  %s2296_s27 = smov 0   ;;  %s2298_s28 = smov 0  }
   0x2   :  { %s2300_s29 = smov 0   ;;  %s2302_s30 = smov 0  }
   0x3   :  { %s2304_s9 = smov 0   ;;  %s2306_s10 = smov 0  }
   0x4 LB: > { %s1827_s11 = sadd.s32 4294967295, %s2246_s10   ;;  %s1828_s12 = sadd.s32 4294967294, %s2246_s10   ;;  %s2246_s10 = sphi %s2306_s10, %s22_s10   ;;  %s2242_s9 = sphi %s2304_s9, %s2890_s9   ;;  %s2238_s30 = sphi %s2302_s30, %s2889_s30   ;;  %s2234_s29 = sphi %s2300_s29, %s2888_s29   ;;  %s2230_s28 = sphi %s2298_s28, %s2887_s28   ;;  %s2226_s27 = sphi %s2296_s27, %s2886_s27  }
   0x5   : > { %s34_s13 = sadd.s32 1, %s2242_s9  ;;  %s237_s14 = sadd.s32 1, %s2234_s29 }
   0x6   : > { %p36_p0 = scmp.ge.s32.totalorder %s34_s13, 2  ;;  %p247_p1 = scmp.ne.s32.totalorder %s2234_s29, %s2230_s28 }
   0x7   : > { %p248_p2 = scmp.eq.s32.totalorder %s1827_s11, 1  ;;  %p253_p3 = scmp.ne.s32.totalorder %s2230_s28, %s2226_s27 }
   0x8   : > { %s2892_s13 = smov (%p36_p0, %s34_s13), 0  ;;  %p254_p5 = scmp.eq.s32.totalorder %s1828_s12, 1 }
   0x9   : > { %p2336_p4 = por %p248_p2, %p247_p1  ;;  %s232_s16 = ssub.s32 %s2242_s9, %s2892_s13 }
   0xa   : > { %p1831_p6 = scmp.ge.s32.totalorder %s2246_s10, 1  ;;  %p235_p7 = scmp.eq.s32.totalorder %s232_s16, 0 }
   0xb   : > { %p2343_p8 = por %p254_p5, %p253_p3  ;;  %p318_p9 = scmp.lt.s32.totalorder %s2246_s10, 3 }
   0xc   : > { %s2349_s18 = scalar_select %p235_p7, %s2234_s29, %s237_s14  }
   0xd   : > { %p319_p10 = pnand %p1831_p6, %p318_p9 }
   0xe   : > { %v466_v0 = vld [vmem:[%s2878_s3] sm:$0xff] (!%p319_p10)  ;;  %v467_v1 = vld [vmem:[%s2878_s3 + $0x8] sm:$0xff] (!%p319_p10)  ;;  %p380_p11 = scmp.lt.s32.totalorder (!%p319_p10), %s2238_s30, 1  ;;  %vm417_vm0 = vcmask (!%p319_p10), 130048   ;;  %v830_v42 = vld [vmem:[%s2880_s5 + $0x10] sm:$0xff] (!%p319_p10)  ;;  %v1227_v46 = vlaneseq (!%p319_p10)  ;;  %vm839_vm3 = vcmask (!%p319_p10), 261120  }
   0xf   : > { %322 = sbr.rel (%p319_p10) target bundleno = 558 (0x22e), region = 48  ;;  %v828_v2 = vld [vmem:[%s2880_s5] sm:$0xff] (!%p319_p10)  ;;  %v2095_v3 = vpack.c.bf16 (!%p319_p10), %v467_v1, %v466_v0  ;;  %v829_v4 = vld [vmem:[%s2880_s5 + $0x8] sm:$0xff] (!%p319_p10)  ;;  %v831_v43 = vld [vmem:[%s2880_s5 + $0x18] sm:$0xff] (!%p319_p10)  ;;  %vm1627_vm4 = vcmask (!%p319_p10), 1041409   ;;  %vm1629_vm5 = vcmask (!%p319_p10), 1042434  }
  0x10   : > { %v2099_v5 = vpack.c.bf16 (!%p319_p10), %v829_v4, %v828_v2  ;;  %v2103_v44 = vpack.c.bf16 (!%p319_p10), %v831_v43, %v830_v42  ;;  %v1228_v48 = vshrl.u32 (!%p319_p10), %v1227_v46, 7  ;;  %vm1631_vm6 = vcmask (!%p319_p10), 1043459   ;;  %s2248_s25 = smov (!%p319_p10), [#allocation2]  }
  0x11   : > { %2096 = vmatprep.subr.bf16.mxu0 (!%p319_p10), %v2095_v3  ;;  %vm1633_vm7 = vcmask (!%p319_p10), 1044484   ;;  %vm1635_vm8 = vcmask (!%p319_p10), 1045509   ;;  %vm1637_vm9 = vcmask (!%p319_p10), 1046534   ;;  %vm1639_vm10 = vcmask (!%p319_p10), 1047559   ;;  %s2172_s26 = sshll.u32 (!%p319_p10), %s2248_s25, 4  ;;  %s2173_s26 = int_to_ptr.vmem [resolvable:$false] %s2172_s26 }
  0x12   : > { %2098 = vmatpush3.bf16.msra.mxu0 (!%p319_p10), %v2095_v3  ;;  %2100 = vmatprep.subr.bf16.mxu1 (!%p319_p10), %v2099_v5  ;;  %v1229_v50 = vsub.s32 (!%p319_p10), 0, %v1228_v48  ;;  %v1240_v51 = vsub.s32 (!%p319_p10), 1, %v1228_v48  ;;  %v1251_v54 = vsub.s32 (!%p319_p10), 2, %v1228_v48  ;;  %v1262_v62 = vsub.s32 (!%p319_p10), 3, %v1228_v48 }
  0x13   : > { %2102 = vmatpush3.bf16.msra.mxu1 (!%p319_p10), %v2099_v5  ;;  %v1273_v2 = vsub.s32 (!%p319_p10), 4, %v1228_v48 }
  0x14   : > { %2104 = vmatprep.subr.bf16.mxu1 (!%p319_p10), %v2103_v44 }
  0x16   : > { %s2365_s11 = scalar_select %p380_p11, %s2238_s30, 1 }
  0x17   : > { %2106 = vmatpush3.bf16.msra.mxu1 %v2103_v44 }
  0x18   : > { %s1913_s12 = sshll.u32 %s2365_s11, 8  ;;  %s1912_s20 = sshll.u32 %s2365_s11, 4 }
  0x19   : > { %s2373_s19 = scalar_lea.vmem %s2876_s1, %s1913_s12  ;;  %s387_s23 = scalar_lea.vmem %s2875_s0, %s1912_s20 }
  0x1a   : > { %v434_v6 = vld [vmem:[%s2373_s19] sm:$0xff]  ;;  %v435_v7 = vld [vmem:[%s2373_s19 + $0x8] sm:$0xff]  ;;  %v436_v8 = vld [vmem:[%s2373_s19 + $0x10] sm:$0xff]  ;;  %s2568_s14 = scalar_lea.vmem %s2882_s7, %s1913_s12  ;;  %s376_s11 = sand.u32 1, %s2230_s28  }
  0x1b   : > { %1991 = vmatprep.mubr.msk.f32.mxu0 %vm417_vm0, %v434_v6  ;;  %v437_v9 = vld [vmem:[%s2373_s19 + $0x18] sm:$0xff]  ;;  %v438_v10 = vld [vmem:[%s2373_s19 + $0x20] sm:$0xff]  ;;  %v439_v11 = vld [vmem:[%s2373_s19 + $0x28] sm:$0xff]  ;;  %v1284_v6 = vsub.s32 5, %v1228_v48  ;;  %s2747_s12 = sshll.u32 %s376_s11, 4 }
  0x1c   : > { %1992 = vmatmul.mubr.msk.f32.vlgmr.msra.gmra.mrb[0].mxu0 %vm417_vm0, %v435_v7  ;;  %v440_v12 = vld [vmem:[%s2373_s19 + $0x30] sm:$0xff]  ;;  %v2394_v13 = vld [vmem:[%s387_s23] sm:$0xff]  ;;  %v441_v14 = vld [vmem:[%s2373_s19 + $0x38] sm:$0xff]  ;;  %s2764_s16 = scalar_lea.vmem [#allocation2], %s2747_s12 }
  0x1d   : > { %1994 = vmatprep.mubr.msk.f32.mxu0 %vm417_vm0, %v436_v8  ;;  %v418_v15 = vsel %vm417_vm0, %v2394_v13, 0.0  ;;  %v2400_v16 = vld [vmem:[%s387_s23 + $0x8] sm:$0xff]  ;;  %v442_v17 = vld [vmem:[%s2373_s19 + $0x40] sm:$0xff]  ;;  %v444_v20 = vld [vmem:[%s2373_s19 + $0x50] sm:$0xff]  ;;  %s403_s23 = scalar_lea.vmem %s2877_s2, %s1912_s20  ;;  %s1681_s21 = sshll.u32 %s2764_s16, 4  ;;  %s2822_s21 = int_to_ptr.vmem [resolvable:$true] %s1681_s21 }
  0x1e   : > { %419 = vadd.xlane.f32.xlu0 %v418_v15  ;;  %v421_v18 = vsel %vm417_vm0, %v2400_v16, 0.0  ;;  %v443_v19 = vld [vmem:[%s2373_s19 + $0x48] sm:$0xff]  ;;  %v445_v21 = vld [vmem:[%s2373_s19 + $0x58] sm:$0xff]  ;;  %v446_v22 = vld [vmem:[%s2373_s19 + $0x60] sm:$0xff]  ;;  %s2168_s24 = scalar_lea.vmem %s2822_s21, 256  ;;  %p2175_p1 = scmp.lt.s32.totalorder %s2822_s21, %s2173_s26 }
  0x1f   : > { %v447_v23 = vld [vmem:[%s2373_s19 + $0x68] sm:$0xff]  ;;  %v448_v24 = vld [vmem:[%s2373_s19 + $0x70] sm:$0xff]  ;;  %v449_v25 = vld [vmem:[%s2373_s19 + $0x78] sm:$0xff]  ;;  %p2169_p12 = scmp.ne.s32.totalorder %s2822_s21, %s2168_s24 }
  0x20   : > { %1995 = vmatmul.mubr.msk.f32.gmra.mrb[2].mxu0 %vm417_vm0, %v437_v9  ;;  %v450_v26 = vld [vmem:[%s2373_s19 + $0x80] sm:$0xff]  ;;  %v451_v27 = vld [vmem:[%s2373_s19 + $0x88] sm:$0xff]  ;;  %v452_v28 = vld [vmem:[%s2373_s19 + $0x90] sm:$0xff]  ;;  %v1295_v9 = vsub.s32 6, %v1228_v48 }
  0x21   : > { %1997 = vmatprep.mubr.msk.f32.mxu0 %vm417_vm0, %v438_v10  ;;  %v453_v29 = vld [vmem:[%s2373_s19 + $0x98] sm:$0xff]  ;;  %v454_v30 = vld [vmem:[%s2373_s19 + $0xa0] sm:$0xff]  ;;  %v455_v31 = vld [vmem:[%s2373_s19 + $0xa8] sm:$0xff]  ;;  %p2170_p13 = pnand %p2169_p12, %p2336_p4 }
  0x22   : > { %422 = vadd.xlane.f32.xlu0 %v421_v18  ;;  %v456_v32 = vld [vmem:[%s2373_s19 + $0xb0] sm:$0xff]  ;;  %v457_v33 = vld [vmem:[%s2373_s19 + $0xb8] sm:$0xff]  ;;  %v458_v34 = vld [vmem:[%s2373_s19 + $0xc0] sm:$0xff] }
  0x23   : > { %v459_v35 = vld [vmem:[%s2373_s19 + $0xc8] sm:$0xff]  ;;  %v460_v36 = vld [vmem:[%s2373_s19 + $0xd0] sm:$0xff]  ;;  %v461_v37 = vld [vmem:[%s2373_s19 + $0xd8] sm:$0xff]  ;;  %p2171_p0 = pneg %p2170_p13 }
  0x24   : > { %1998 = vmatmul.mubr.msk.f32.gmra.mrb[4].mxu0 %vm417_vm0, %v439_v11  ;;  %v462_v38 = vld [vmem:[%s2373_s19 + $0xe0] sm:$0xff]  ;;  %v463_v39 = vld [vmem:[%s2373_s19 + $0xe8] sm:$0xff]  ;;  %v464_v40 = vld [vmem:[%s2373_s19 + $0xf0] sm:$0xff] }
  0x25   : > { %2000 = vmatprep.mubr.msk.f32.mxu0 %vm417_vm0, %v440_v12  ;;  %v465_v41 = vld [vmem:[%s2373_s19 + $0xf8] sm:$0xff]  ;;  %v1306_v12 = vsub.s32 7, %v1228_v48  ;;  %s1916_s19 = sshll.u32 %s2238_s30, 8  ;;  %s2829_s30 = scalar_lea.sflag [#allocation3], %s376_s11 }
  0x26   : > { %s2820_s20 = scalar_lea.hbm %s2883_s8, %s1916_s19 }
  0x28   : > { %2001 = vmatmul.mubr.msk.f32.gmra.mrb[6].mxu0 %vm417_vm0, %v441_v14  ;;  %v2464_v14 = vld [vmem:[%s2879_s4] ss:$0 sm:$0xff] }
  0x29   : > { %2003 = vmatprep.mubr.msk.f32.mxu0 %vm417_vm0, %v442_v17 }
  0x2c   : > { %2004 = vmatmul.mubr.msk.f32.gmra.mrb[8].mxu0 %vm417_vm0, %v443_v19 }
  0x2d   : > { %2006 = vmatprep.mubr.msk.f32.mxu0 %vm417_vm0, %v444_v20 }
  0x30   : > { %2007 = vmatmul.mubr.msk.f32.gmra.mrb[10].mxu0 %vm417_vm0, %v445_v21 }
  0x31   : > { %2009 = vmatprep.mubr.msk.f32.mxu0 %vm417_vm0, %v446_v22 }
  0x34   : > { %2010 = vmatmul.mubr.msk.f32.gmra.mrb[12].mxu0 %vm417_vm0, %v447_v23 }
  0x35   : > { %2012 = vmatprep.mubr.msk.f32.mxu0 %vm417_vm0, %v448_v24 }
  0x38   : > { %2013 = vmatmul.mubr.msk.f32.gmra.mrb[14].mxu0 %vm417_vm0, %v449_v25 }
  0x39   : > { %2015 = vmatprep.mubr.msk.f32.mxu0 %vm417_vm0, %v450_v26 }
  0x3c   : > { %2016 = vmatmul.mubr.msk.f32.gmra.mrb[16].mxu0 %vm417_vm0, %v451_v27 }
  0x3d   : > { %2018 = vmatprep.mubr.msk.f32.mxu0 %vm417_vm0, %v452_v28 }
  0x40   : > { %2019 = vmatmul.mubr.msk.f32.gmra.mrb[18].mxu0 %vm417_vm0, %v453_v29 }
  0x41   : > { %2021 = vmatprep.mubr.msk.f32.mxu0 %vm417_vm0, %v454_v30 }
  0x44   : > { %2022 = vmatmul.mubr.msk.f32.gmra.mrb[20].mxu0 %vm417_vm0, %v455_v31 }
  0x45   : > { %2024 = vmatprep.mubr.msk.f32.mxu0 %vm417_vm0, %v456_v32 }
  0x48   : > { %2025 = vmatmul.mubr.msk.f32.gmra.mrb[22].mxu0 %vm417_vm0, %v457_v33 }
  0x49   : > { %2027 = vmatprep.mubr.msk.f32.mxu0 %vm417_vm0, %v458_v34 }
  0x4c   : > { %2028 = vmatmul.mubr.msk.f32.gmra.mrb[24].mxu0 %vm417_vm0, %v459_v35 }
  0x4d   : > { %2030 = vmatprep.mubr.msk.f32.mxu0 %vm417_vm0, %v460_v36 }
  0x50   : > { %2031 = vmatmul.mubr.msk.f32.gmra.mrb[26].mxu0 %vm417_vm0, %v461_v37 }
  0x51   : > { %2033 = vmatprep.mubr.msk.f32.mxu0 %vm417_vm0, %v462_v38 }
  0x54   : > { %2034 = vmatmul.mubr.msk.f32.gmra.mrb[28].mxu0 %vm417_vm0, %v463_v39 }
  0x55   : > { %2036 = vmatprep.mubr.msk.f32.mxu0 %vm417_vm0, %v464_v40 }
  0x58   : > { %2037 = vmatmul.mubr.msk.f32.gmra.mrb[30].mxu0 %vm417_vm0, %v465_v41 }
  0xab   : > { %v420_v45 = vpop.xlane.xlu0 %419 }
  0xac   : > { %2164 = vrcp.f32 %v420_v45  ;;  %vm424_vm1 = vcmp.eq.f32.partialorder %v420_v45, 0.0 }
  0xaf   : > { %v423_v47 = vpop.xlane.xlu0 %422 }
  0xb0   : > { %2166 = vrcp.f32 %v423_v47  ;;  %vm425_vm2 = vcmp.eq.f32.partialorder %v423_v47, 0.0 }
  0xb6   : > { %v2165_v49 = vpop.eup %2164 }
  0xb7   : > { %v430_v52 = vsel %vm424_vm1, 0.0, %v2165_v49 }
  0xb8   : > { %v432_v53 = vmul.f32 %v430_v52, %v2394_v13 }
  0xba   : > { %v2167_v55 = vpop.eup %2166  ;;  %v1230_v56 = vrot.slane %v432_v53, %v1229_v50  ;;  %v1241_v57 = vrot.slane %v432_v53, %v1240_v51  ;;  %v1252_v59 = vrot.slane %v432_v53, %v1251_v54  ;;  %v1263_v0 = vrot.slane %v432_v53, %v1262_v62 }
  0xbb   : > { %v431_v58 = vsel %vm425_vm2, 0.0, %v2167_v55  ;;  %v1274_v4 = vrot.slane %v432_v53, %v1273_v2  ;;  %v1285_v7 = vrot.slane %v432_v53, %v1284_v6  ;;  %v1296_v10 = vrot.slane %v432_v53, %v1295_v9 }
  0xbc   : > { %1232 = vbcast.lane.b32.xlu1 %v1230_v56, 256  ;;  %1243 = vbcast.lane.b32.xlu0 %v1241_v57, 256  ;;  %v433_v60 = vmul.f32 %v431_v58, %v2400_v16  ;;  %v1307_v13 = vrot.slane %v432_v53, %v1306_v12 }
  0xbe   : > { %v1340_v61 = vrot.slane %v433_v60, %v1251_v54  ;;  %v1318_v63 = vrot.slane %v433_v60, %v1229_v50  ;;  %v1351_v1 = vrot.slane %v433_v60, %v1262_v62  ;;  %v1329_v3 = vrot.slane %v433_v60, %v1240_v51 }
  0xbf   : > { %v1362_v5 = vrot.slane %v433_v60, %v1273_v2  ;;  %v1373_v8 = vrot.slane %v433_v60, %v1284_v6  ;;  %v1384_v11 = vrot.slane %v433_v60, %v1295_v9  ;;  %v1395_v18 = vrot.slane %v433_v60, %v1306_v12 }
  0xc0   : > { %1236 = vbcast.lane.b32.xlu1 %v1230_v56, 264  ;;  %1258 = vbcast.lane.b32.xlu0 %v1252_v59, 264 }
  0xc4   : > { %1247 = vbcast.lane.b32.xlu1 %v1241_v57, 264  ;;  %1346 = vbcast.lane.b32.xlu0 %v1340_v61, 264 }
  0xc8   : > { %1320 = vbcast.lane.b32.xlu1 %v1318_v63, 256  ;;  %1269 = vbcast.lane.b32.xlu0 %v1263_v0, 264 }
  0xcc   : > { %1324 = vbcast.lane.b32.xlu1 %v1318_v63, 264  ;;  %1357 = vbcast.lane.b32.xlu0 %v1351_v1, 264 }
  0xd0   : > { %1331 = vbcast.lane.b32.xlu1 %v1329_v3, 256  ;;  %1280 = vbcast.lane.b32.xlu0 %v1274_v4, 264 }
  0xd4   : > { %1335 = vbcast.lane.b32.xlu1 %v1329_v3, 264  ;;  %1368 = vbcast.lane.b32.xlu0 %v1362_v5, 264 }
  0xd8   : > { %1254 = vbcast.lane.b32.xlu1 %v1252_v59, 256  ;;  %1291 = vbcast.lane.b32.xlu0 %v1285_v7, 264 }
  0xdc   : > { %1342 = vbcast.lane.b32.xlu1 %v1340_v61, 256  ;;  %1379 = vbcast.lane.b32.xlu0 %v1373_v8, 264 }
  0xe0   : > { %1265 = vbcast.lane.b32.xlu1 %v1263_v0, 256  ;;  %1302 = vbcast.lane.b32.xlu0 %v1296_v10, 264 }
  0xe4   : > { %1353 = vbcast.lane.b32.xlu1 %v1351_v1, 256  ;;  %1390 = vbcast.lane.b32.xlu0 %v1384_v11, 264 }
  0xe8   : > { %1276 = vbcast.lane.b32.xlu1 %v1274_v4, 256  ;;  %1313 = vbcast.lane.b32.xlu0 %v1307_v13, 264 }
  0xec   : > { %1364 = vbcast.lane.b32.xlu1 %v1362_v5, 256  ;;  %1401 = vbcast.lane.b32.xlu0 %v1395_v18, 264 }
  0xef   : > { %v1993_v15 = vpop.f32.mrb[0].mxu0 }
  0xf0   : > { %v643_v16 = vadd.f32 %v1993_v15, %v2464_v14  ;;  %v637_v17 = vpop.f32.mrb[1].mxu0  ;;  %1287 = vbcast.lane.b32.xlu1 %v1285_v7, 256 }
  0xf1   : > { %v638_v19 = vadd.f32 %v2464_v14, %v637_v17 }
  0xf2   : > { %v797_v22 = vmax.f32 %v643_v16, 0.0 }
  0xf3   : > { %v796_v20 = vmax.f32 %v638_v19, 0.0  ;;  %v1996_v21 = vpop.f32.mrb[2].mxu0 }
  0xf4   : > { %v653_v23 = vadd.f32 %v1996_v21, %v2464_v14  ;;  %v647_v24 = vpop.f32.mrb[3].mxu0  ;;  %1375 = vbcast.lane.b32.xlu1 %v1373_v8, 256 }
  0xf5   : > { %v648_v25 = vadd.f32 %v2464_v14, %v647_v24  ;;  %2047 = vmatprep.mubr.msk.f32.mxu1 %vm839_vm3, %v796_v20 }
  0xf6   : > { %2048 = vmatmul.mubr.msk.f32.vlgmr.msra.gmra.mrb[0].mxu1 %vm839_vm3, %v797_v22  ;;  %v799_v28 = vmax.f32 %v653_v23, 0.0 }
  0xf7   : > { %v798_v26 = vmax.f32 %v648_v25, 0.0  ;;  %v1999_v27 = vpop.f32.mrb[4].mxu0 }
  0xf8   : > { %v663_v29 = vadd.f32 %v1999_v27, %v2464_v14  ;;  %v657_v30 = vpop.f32.mrb[5].mxu0  ;;  %1298 = vbcast.lane.b32.xlu1 %v1296_v10, 256 }
  0xf9   : > { %v658_v31 = vadd.f32 %v2464_v14, %v657_v30  ;;  %2050 = vmatprep.mubr.msk.f32.mxu1 %vm839_vm3, %v798_v26 }
  0xfa   : > { %2051 = vmatmul.mubr.msk.f32.gmra.mrb[2].mxu1 %vm839_vm3, %v799_v28  ;;  %v801_v34 = vmax.f32 %v663_v29, 0.0 }
  0xfb   : > { %v800_v32 = vmax.f32 %v658_v31, 0.0  ;;  %v2002_v33 = vpop.f32.mrb[6].mxu0 }
  0xfc   : > { %v673_v35 = vadd.f32 %v2002_v33, %v2464_v14  ;;  %v667_v36 = vpop.f32.mrb[7].mxu0  ;;  %1386 = vbcast.lane.b32.xlu1 %v1384_v11, 256 }
  0xfd   : > { %v668_v37 = vadd.f32 %v2464_v14, %v667_v36  ;;  %2053 = vmatprep.mubr.msk.f32.mxu1 %vm839_vm3, %v800_v32 }
  0xfe   : > { %2054 = vmatmul.mubr.msk.f32.gmra.mrb[4].mxu1 %vm839_vm3, %v801_v34  ;;  %v803_v40 = vmax.f32 %v673_v35, 0.0 }
  0xff   : > { %v802_v38 = vmax.f32 %v668_v37, 0.0  ;;  %v2005_v39 = vpop.f32.mrb[8].mxu0 }
 0x100   : > { %v683_v41 = vadd.f32 %v2005_v39, %v2464_v14  ;;  %v677_v42 = vpop.f32.mrb[9].mxu0  ;;  %1309 = vbcast.lane.b32.xlu1 %v1307_v13, 256 }
 0x101   : > { %v678_v43 = vadd.f32 %v2464_v14, %v677_v42  ;;  %2056 = vmatprep.mubr.msk.f32.mxu1 %vm839_vm3, %v802_v38 }
 0x102   : > { %2057 = vmatmul.mubr.msk.f32.gmra.mrb[6].mxu1 %vm839_vm3, %v803_v40  ;;  %v805_v46 = vmax.f32 %v683_v41, 0.0 }
 0x103   : > { %v804_v44 = vmax.f32 %v678_v43, 0.0  ;;  %v2008_v45 = vpop.f32.mrb[10].mxu0 }
 0x104   : > { %v693_v47 = vadd.f32 %v2008_v45, %v2464_v14  ;;  %v687_v48 = vpop.f32.mrb[11].mxu0  ;;  %1397 = vbcast.lane.b32.xlu1 %v1395_v18, 256 }
 0x105   : > { %v688_v49 = vadd.f32 %v2464_v14, %v687_v48  ;;  %2059 = vmatprep.mubr.msk.f32.mxu1 %vm839_vm3, %v804_v44 }
 0x106   : > { %2060 = vmatmul.mubr.msk.f32.gmra.mrb[8].mxu1 %vm839_vm3, %v805_v46  ;;  %v807_v52 = vmax.f32 %v693_v47, 0.0 }
 0x107   : > { %v806_v50 = vmax.f32 %v688_v49, 0.0  ;;  %v2011_v51 = vpop.f32.mrb[12].mxu0 }
 0x108   : > { %v703_v53 = vadd.f32 %v2011_v51, %v2464_v14  ;;  %v697_v54 = vpop.f32.mrb[13].mxu0 }
 0x109   : > { %v698_v55 = vadd.f32 %v2464_v14, %v697_v54  ;;  %2062 = vmatprep.mubr.msk.f32.mxu1 %vm839_vm3, %v806_v50  ;;  %v2540_v54 = vld [vmem:[%s403_s23 + $0x8] sm:$0xff] }
 0x10a   : > { %2063 = vmatmul.mubr.msk.f32.gmra.mrb[10].mxu1 %vm839_vm3, %v807_v52  ;;  %v809_v58 = vmax.f32 %v703_v53, 0.0  ;;  %v2535_v52 = vld [vmem:[%s403_s23] sm:$0xff] }
 0x10b   : > { %v808_v56 = vmax.f32 %v698_v55, 0.0  ;;  %v2014_v57 = vpop.f32.mrb[14].mxu0 }
 0x10c   : > { %v713_v59 = vadd.f32 %v2014_v57, %v2464_v14  ;;  %v707_v60 = vpop.f32.mrb[15].mxu0 }
 0x10d   : > { %v708_v61 = vadd.f32 %v2464_v14, %v707_v60  ;;  %2065 = vmatprep.mubr.msk.f32.mxu1 %vm839_vm3, %v808_v56 }
 0x10e   : > { %2066 = vmatmul.mubr.msk.f32.gmra.mrb[12].mxu1 %vm839_vm3, %v809_v58  ;;  %v811_v0 = vmax.f32 %v713_v59, 0.0 }
 0x10f   : > { %v810_v62 = vmax.f32 %v708_v61, 0.0  ;;  %v2017_v63 = vpop.f32.mrb[16].mxu0 }
 0x110   : > { %v723_v1 = vadd.f32 %v2017_v63, %v2464_v14  ;;  %v717_v2 = vpop.f32.mrb[17].mxu0 }
 0x111   : > { %v718_v3 = vadd.f32 %v2464_v14, %v717_v2  ;;  %2068 = vmatprep.mubr.msk.f32.mxu1 %vm839_vm3, %v810_v62 }
 0x112   : > { %2069 = vmatmul.mubr.msk.f32.gmra.mrb[14].mxu1 %vm839_vm3, %v811_v0  ;;  %v813_v6 = vmax.f32 %v723_v1, 0.0 }
 0x113   : > { %v812_v4 = vmax.f32 %v718_v3, 0.0  ;;  %v2020_v5 = vpop.f32.mrb[18].mxu0 }
 0x114   : > { %v733_v7 = vadd.f32 %v2020_v5, %v2464_v14  ;;  %v727_v8 = vpop.f32.mrb[19].mxu0 }
 0x115   : > { %v728_v9 = vadd.f32 %v2464_v14, %v727_v8  ;;  %2071 = vmatprep.mubr.msk.f32.mxu1 %vm839_vm3, %v812_v4 }
 0x116   : > { %2072 = vmatmul.mubr.msk.f32.gmra.mrb[16].mxu1 %vm839_vm3, %v813_v6  ;;  %v815_v12 = vmax.f32 %v733_v7, 0.0 }
 0x117   : > { %v814_v10 = vmax.f32 %v728_v9, 0.0  ;;  %v2023_v11 = vpop.f32.mrb[20].mxu0 }
 0x118   : > { %v743_v13 = vadd.f32 %v2023_v11, %v2464_v14  ;;  %v737_v15 = vpop.f32.mrb[21].mxu0 }
 0x119   : > { %v738_v16 = vadd.f32 %v2464_v14, %v737_v15  ;;  %2074 = vmatprep.mubr.msk.f32.mxu1 %vm839_vm3, %v814_v10  ;;  %v2558_v15 = vld [vmem:[%s2881_s6] ss:$0 sm:$0xff] }
 0x11a   : > { %2075 = vmatmul.mubr.msk.f32.gmra.mrb[18].mxu1 %vm839_vm3, %v815_v12  ;;  %v817_v19 = vmax.f32 %v743_v13, 0.0 }
 0x11b   : > { %v816_v17 = vmax.f32 %v738_v16, 0.0  ;;  %v2026_v18 = vpop.f32.mrb[22].mxu0 }
 0x11c   : > { %v753_v20 = vadd.f32 %v2026_v18, %v2464_v14  ;;  %v747_v21 = vpop.f32.mrb[23].mxu0 }
 0x11d   : > { %v748_v22 = vadd.f32 %v2464_v14, %v747_v21  ;;  %2077 = vmatprep.mubr.msk.f32.mxu1 %vm839_vm3, %v816_v17 }
 0x11e   : > { %2078 = vmatmul.mubr.msk.f32.gmra.mrb[20].mxu1 %vm839_vm3, %v817_v19  ;;  %v819_v25 = vmax.f32 %v753_v20, 0.0 }
 0x11f   : > { %v818_v23 = vmax.f32 %v748_v22, 0.0  ;;  %v2029_v24 = vpop.f32.mrb[24].mxu0 }
 0x120   : > { %v763_v26 = vadd.f32 %v2029_v24, %v2464_v14  ;;  %v757_v27 = vpop.f32.mrb[25].mxu0 }
 0x121   : > { %v758_v28 = vadd.f32 %v2464_v14, %v757_v27  ;;  %2080 = vmatprep.mubr.msk.f32.mxu1 %vm839_vm3, %v818_v23 }
 0x122   : > { %2081 = vmatmul.mubr.msk.f32.gmra.mrb[22].mxu1 %vm839_vm3, %v819_v25  ;;  %v821_v31 = vmax.f32 %v763_v26, 0.0 }
 0x123   : > { %v820_v29 = vmax.f32 %v758_v28, 0.0  ;;  %v2032_v30 = vpop.f32.mrb[26].mxu0 }
 0x124   : > { %v773_v32 = vadd.f32 %v2032_v30, %v2464_v14  ;;  %v767_v33 = vpop.f32.mrb[27].mxu0 }
 0x125   : > { %v768_v34 = vadd.f32 %v2464_v14, %v767_v33  ;;  %2083 = vmatprep.mubr.msk.f32.mxu1 %vm839_vm3, %v820_v29 }
 0x126   : > { %2084 = vmatmul.mubr.msk.f32.gmra.mrb[24].mxu1 %vm839_vm3, %v821_v31  ;;  %v823_v37 = vmax.f32 %v773_v32, 0.0 }
 0x127   : > { %v822_v35 = vmax.f32 %v768_v34, 0.0  ;;  %v2035_v36 = vpop.f32.mrb[28].mxu0 }
 0x128   : > { %v783_v38 = vadd.f32 %v2035_v36, %v2464_v14  ;;  %v777_v39 = vpop.f32.mrb[29].mxu0 }
 0x129   : > { %v778_v40 = vadd.f32 %v2464_v14, %v777_v39  ;;  %2086 = vmatprep.mubr.msk.f32.mxu1 %vm839_vm3, %v822_v35 }
 0x12a   : > { %2087 = vmatmul.mubr.msk.f32.gmra.mrb[26].mxu1 %vm839_vm3, %v823_v37  ;;  %v825_v43 = vmax.f32 %v783_v38, 0.0 }
 0x12b   : > { %v824_v41 = vmax.f32 %v778_v40, 0.0  ;;  %v2038_v42 = vpop.f32.mrb[30].mxu0 }
 0x12c   : > { %v793_v44 = vadd.f32 %v2038_v42, %v2464_v14  ;;  %v787_v45 = vpop.f32.mrb[31].mxu0 }
 0x12d   : > { %v788_v46 = vadd.f32 %v2464_v14, %v787_v45  ;;  %2089 = vmatprep.mubr.msk.f32.mxu1 %vm839_vm3, %v824_v41 }
 0x12e   : > { %2090 = vmatmul.mubr.msk.f32.gmra.mrb[28].mxu1 %vm839_vm3, %v825_v43  ;;  %v827_v48 = vmax.f32 %v793_v44, 0.0  ;;  %v1233_v49 = vpop.permute.xlu1 %1232  ;;  %v1244_v61 = vpop.permute.xlu0 %1243 }
 0x12f   : > { %v826_v47 = vmax.f32 %v788_v46, 0.0  ;;  %v1403_v22 = vmul.f32 %v1233_v49, %v2535_v52  ;;  %v1405_v24 = vmul.f32 %v1244_v61, %v2535_v52 }
 0x131   : > { %2092 = vmatprep.mubr.msk.f32.mxu1 %vm839_vm3, %v826_v47 }
 0x132   : > { %2093 = vmatmul.mubr.msk.f32.gmra.mrb[30].mxu1 %vm839_vm3, %v827_v48  ;;  %v1237_v50 = vpop.permute.xlu1 %1236  ;;  %v1259_v62 = vpop.permute.xlu0 %1258 }
 0x133   : > { %v1404_v23 = vmul.f32 %v1237_v50, %v2540_v54  ;;  %v1408_v27 = vmul.f32 %v1259_v62, %v2540_v54 }
 0x136   : > { %v1248_v51 = vpop.permute.xlu1 %1247  ;;  %v1347_v63 = vpop.permute.xlu0 %1346 }
 0x137   : > { %v1406_v26 = vmul.f32 %v1248_v51, %v2540_v54  ;;  %v2577_v28 = vmul.f32 %v1347_v63, %v2540_v54 }
 0x13a   : > { %v1321_v14 = vpop.permute.xlu1 %1320  ;;  %v1270_v1 = vpop.permute.xlu0 %1269 }
 0x13b   : > { %v2538_v53 = vmul.f32 %v1321_v14, %v2535_v52  ;;  %v2580_v31 = vmul.f32 %v1270_v1, %v2540_v54 }
 0x13e   : > { %v1325_v55 = vpop.permute.xlu1 %1324  ;;  %v1358_v3 = vpop.permute.xlu0 %1357 }
 0x13f   : > { %v2543_v56 = vmul.f32 %v1325_v55, %v2540_v54  ;;  %v2583_v32 = vmul.f32 %v1358_v3, %v2540_v54 }
 0x142   : > { %v1332_v57 = vpop.permute.xlu1 %1331  ;;  %v1281_v5 = vpop.permute.xlu0 %1280 }
 0x143   : > { %v2546_v58 = vmul.f32 %v1332_v57, %v2535_v52  ;;  %v2589_v36 = vmul.f32 %v1281_v5, %v2540_v54 }
 0x146   : > { %v1336_v59 = vpop.permute.xlu1 %1335  ;;  %v1369_v7 = vpop.permute.xlu0 %1368 }
 0x147   : > { %v2549_v60 = vmul.f32 %v1336_v59, %v2540_v54  ;;  %v2592_v37 = vmul.f32 %v1369_v7, %v2540_v54 }
 0x14a   : > { %v1255_v0 = vpop.permute.xlu1 %1254  ;;  %v1292_v9 = vpop.permute.xlu0 %1291 }
 0x14b   : > { %v1407_v41 = vmul.f32 %v1255_v0, %v2535_v52  ;;  %v2601_v42 = vmul.f32 %v1292_v9, %v2540_v54 }
 0x14e   : > { %v1343_v2 = vpop.permute.xlu1 %1342  ;;  %v1380_v11 = vpop.permute.xlu0 %1379 }
 0x14f   : > { %v2605_v46 = vmul.f32 %v1343_v2, %v2535_v52  ;;  %v2608_v47 = vmul.f32 %v1380_v11, %v2540_v54 }
 0x152   : > { %v1266_v4 = vpop.permute.xlu1 %1265  ;;  %v1303_v13 = vpop.permute.xlu0 %1302 }
 0x153   : > { %v1409_v51 = vmul.f32 %v1266_v4, %v2535_v52  ;;  %v2619_v62 = vmul.f32 %v1303_v13, %v2540_v54 }
 0x156   : > { %v1354_v6 = vpop.permute.xlu1 %1353  ;;  %v1391_v18 = vpop.permute.xlu0 %1390 }
 0x157   : > { %v2616_v61 = vmul.f32 %v1354_v6, %v2535_v52  ;;  %v2625_v1 = vmul.f32 %v1391_v18, %v2540_v54 }
 0x15a   : > { %v1277_v8 = vpop.permute.xlu1 %1276  ;;  %v1314_v43 = vpop.permute.xlu0 %1313 }
 0x15b   : > { %v1411_v6 = vmul.f32 %v1277_v8, %v2535_v52  ;;  %v2630_v9 = vmul.f32 %v1314_v43, %v2540_v54 }
 0x15e   : > { %v2551_v10 = vpop.permute.xlu1 %1364  ;;  %v1402_v2 = vpop.permute.xlu0 %1401 }
 0x15f   : > { %v2641_v8 = vmul.f32 %v1402_v2, %v2540_v54 }
 0x162   : > { %v2553_v12 = vpop.permute.xlu1 %1287 }
 0x166   : > { %v2560_v16 = vpop.permute.xlu1 %1375 }
 0x16a   : > { %v2594_v38 = vpop.permute.xlu1 %1298 }
 0x16e   : > { %v1387_v7 = vpop.permute.xlu1 %1386 }
 0x1c9   : > { %v2049_v17 = vpop.f32.mrb[0].mxu1 }
 0x1ca   : > { %v1008_v19 = vadd.f32 %v2049_v17, %v2558_v15  ;;  %v1002_v20 = vpop.f32.mrb[1].mxu1 }
 0x1cb   : > { %v1003_v21 = vadd.f32 %v2558_v15, %v1002_v20 }
 0x1cc   : > { %v1162_v25 = vmax.f32 %v1008_v19, 0.0 }
 0x1cd   : > { %v1161_v29 = vmax.f32 %v1003_v21, 0.0  ;;  %v2052_v30 = vpop.f32.mrb[2].mxu1 }
 0x1ce   : > { %1194 = vst.msk [vmem:[%s2568_s14 + $0x8] sm:$0xff] %vm839_vm3, %v1162_v25  ;;  %v1436_v33 = vmul.f32 %v1404_v23, %v1162_v25  ;;  %v1018_v34 = vadd.f32 %v2052_v30, %v2558_v15  ;;  %v1012_v35 = vpop.f32.mrb[3].mxu1  ;;  %v2638_v23 = vmul.f32 %v2551_v10, %v2535_v52  ;;  %v2651_v10 = vmul.f32 %v2560_v16, %v2535_v52 }
 0x1cf   : > { %1193 = vst.msk [vmem:[%s2568_s14] sm:$0xff] %vm839_vm3, %v1161_v29  ;;  %v1435_v39 = vmul.f32 %v1403_v22, %v1161_v29  ;;  %v1013_v40 = vadd.f32 %v2558_v15, %v1012_v35 }
 0x1d0   : > { %v1468_v44 = vsel %vm839_vm3, %v1436_v33, 0.0  ;;  %v1164_v45 = vmax.f32 %v1018_v34, 0.0  ;;  %v1413_v33 = vmul.f32 %v2553_v12, %v2535_v52  ;;  %v2659_v12 = vmul.f32 %v2594_v38, %v2535_v52 }
 0x1d1   : > { %v1467_v48 = vsel %vm839_vm3, %v1435_v39, 0.0  ;;  %v1163_v49 = vmax.f32 %v1013_v40, 0.0  ;;  %v2055_v50 = vpop.f32.mrb[4].mxu1 }
 0x1d2   : > { %v1469_v14 = vadd.f32 %v1468_v44, %v1467_v48  ;;  %1196 = vst.msk [vmem:[%s2568_s14 + $0x18] sm:$0xff] %vm839_vm3, %v1164_v45  ;;  %v1438_v55 = vmul.f32 %v1406_v26, %v1164_v45  ;;  %v1028_v57 = vadd.f32 %v2055_v50, %v2558_v15  ;;  %v1022_v59 = vpop.f32.mrb[5].mxu1  ;;  %v1310_v45 = vpop.permute.xlu1 %1309 }
 0x1d3   : > { %1195 = vst.msk [vmem:[%s2568_s14 + $0x10] sm:$0xff] %vm839_vm3, %v1163_v49  ;;  %v1437_v63 = vmul.f32 %v1405_v24, %v1163_v49  ;;  %v1023_v0 = vadd.f32 %v2558_v15, %v1022_v59 }
 0x1d4   : > { %v1470_v3 = vrot.slane %v1469_v14, 4  ;;  %v1477_v4 = vsel %vm839_vm3, %v1438_v55, 0.0  ;;  %v1166_v5 = vmax.f32 %v1028_v57, 0.0  ;;  %v2667_v57 = vmul.f32 %v1387_v7, %v2535_v52 }
 0x1d5   : > { %v1476_v11 = vsel %vm839_vm3, %v1437_v63, 0.0  ;;  %v1165_v13 = vmax.f32 %v1023_v0, 0.0  ;;  %v2058_v17 = vpop.f32.mrb[6].mxu1  ;;  %v2671_v0 = vmul.f32 %v1310_v45, %v2535_v52 }
 0x1d6   : > { %v1471_v19 = vadd.f32 %v1470_v3, %v1469_v14  ;;  %v1478_v20 = vadd.f32 %v1477_v4, %v1476_v11  ;;  %1198 = vst.msk [vmem:[%s2568_s14 + $0x28] sm:$0xff] %vm839_vm3, %v1166_v5  ;;  %v1440_v18 = vmul.f32 %v1408_v27, %v1166_v5  ;;  %v1038_v21 = vadd.f32 %v2058_v17, %v2558_v15  ;;  %v1032_v22 = vpop.f32.mrb[7].mxu1 }
 0x1d7   : > { %1197 = vst.msk [vmem:[%s2568_s14 + $0x20] sm:$0xff] %vm839_vm3, %v1165_v13  ;;  %v1439_v24 = vmul.f32 %v1407_v41, %v1165_v13  ;;  %v1033_v25 = vadd.f32 %v2558_v15, %v1032_v22 }
 0x1d8   : > { %v1472_v26 = vrot.slane %v1471_v19, 2  ;;  %v1479_v29 = vrot.slane %v1478_v20, 4  ;;  %v1486_v27 = vsel %vm839_vm3, %v1440_v18, 0.0  ;;  %v1168_v30 = vmax.f32 %v1038_v21, 0.0 }
 0x1d9   : > { %v1485_v54 = vsel %vm839_vm3, %v1439_v24, 0.0  ;;  %v1167_v34 = vmax.f32 %v1033_v25, 0.0  ;;  %v2061_v35 = vpop.f32.mrb[8].mxu1 }
 0x1da   : > { %v1473_v39 = vadd.f32 %v1472_v26, %v1471_v19  ;;  %v1480_v40 = vadd.f32 %v1479_v29, %v1478_v20  ;;  %v1487_v41 = vadd.f32 %v1486_v27, %v1485_v54  ;;  %1200 = vst.msk [vmem:[%s2568_s14 + $0x38] sm:$0xff] %vm839_vm3, %v1168_v30  ;;  %v1442_v43 = vmul.f32 %v2580_v31, %v1168_v30  ;;  %v1042_v44 = vpop.f32.mrb[9].mxu1 }
 0x1db   : > { %1199 = vst.msk [vmem:[%s2568_s14 + $0x30] sm:$0xff] %vm839_vm3, %v1167_v34  ;;  %v1441_v16 = vmul.f32 %v1409_v51, %v1167_v34  ;;  %v1048_v48 = vadd.f32 %v2061_v35, %v2558_v15  ;;  %v1043_v49 = vadd.f32 %v2558_v15, %v1042_v44 }
 0x1dc   : > { %v1474_v50 = vrot.slane %v1473_v39, 1  ;;  %v1481_v14 = vrot.slane %v1480_v40, 2  ;;  %v1488_v55 = vrot.slane %v1487_v41, 4  ;;  %v1495_v31 = vsel %vm839_vm3, %v1442_v43, 0.0 }
 0x1dd   : > { %v1494_v38 = vsel %vm839_vm3, %v1441_v16, 0.0  ;;  %v1170_v59 = vmax.f32 %v1048_v48, 0.0  ;;  %v1169_v63 = vmax.f32 %v1043_v49, 0.0  ;;  %v2064_v51 = vpop.f32.mrb[10].mxu1 }
 0x1de   : > { %v1482_v2 = vadd.f32 %v1481_v14, %v1480_v40  ;;  %v1489_v3 = vadd.f32 %v1488_v55, %v1487_v41  ;;  %v1496_v4 = vadd.f32 %v1495_v31, %v1494_v38  ;;  %v1052_v5 = vpop.f32.mrb[11].mxu1  ;;  %v1058_v13 = vadd.f32 %v2064_v51, %v2558_v15 }
 0x1df   : > { %1202 = vst.msk [vmem:[%s2568_s14 + $0x48] sm:$0xff] %vm839_vm3, %v1170_v59  ;;  %v1444_v11 = vmul.f32 %v2589_v36, %v1170_v59  ;;  %1201 = vst.msk [vmem:[%s2568_s14 + $0x40] sm:$0xff] %vm839_vm3, %v1169_v63  ;;  %v1443_v7 = vmul.f32 %v1411_v6, %v1169_v63  ;;  %v1053_v17 = vadd.f32 %v2558_v15, %v1052_v5 }
 0x1e0   : > { %v1475_v19 = vadd.f32 %v1474_v50, %v1473_v39  ;;  %v1483_v20 = vrot.slane %v1482_v2, 1  ;;  %v1490_v18 = vrot.slane %v1489_v3, 2  ;;  %v1497_v21 = vrot.slane %v1496_v4, 4 }
 0x1e1   : > { %v1504_v22 = vsel %vm839_vm3, %v1444_v11, 0.0  ;;  %v1503_v24 = vsel %vm839_vm3, %v1443_v7, 0.0  ;;  %v1172_v25 = vmax.f32 %v1058_v13, 0.0  ;;  %v1171_v36 = vmax.f32 %v1053_v17, 0.0  ;;  %v2067_v26 = vpop.f32.mrb[12].mxu1 }
 0x1e2   : > { %v1484_v29 = vadd.f32 %v1483_v20, %v1482_v2  ;;  %v1491_v6 = vadd.f32 %v1490_v18, %v1489_v3  ;;  %v1498_v27 = vadd.f32 %v1497_v21, %v1496_v4  ;;  %v1505_v30 = vadd.f32 %v1504_v22, %v1503_v24  ;;  %v1062_v54 = vpop.f32.mrb[13].mxu1 }
 0x1e3   : > { %1204 = vst.msk [vmem:[%s2568_s14 + $0x58] sm:$0xff] %vm839_vm3, %v1172_v25  ;;  %v1446_v34 = vmul.f32 %v2601_v42, %v1172_v25  ;;  %1203 = vst.msk [vmem:[%s2568_s14 + $0x50] sm:$0xff] %vm839_vm3, %v1171_v36  ;;  %v1445_v35 = vmul.f32 %v1413_v33, %v1171_v36  ;;  %v1068_v39 = vadd.f32 %v2067_v26, %v2558_v15 }
 0x1e4   : > { %v1063_v40 = vadd.f32 %v2558_v15, %v1062_v54  ;;  %v1628_v41 = vsel %vm1627_vm4, %v1484_v29, %v1475_v19  ;;  %v1492_v43 = vrot.slane %v1491_v6, 1  ;;  %v1499_v44 = vrot.slane %v1498_v27, 2 }
 0x1e5   : > { %v1506_v45 = vrot.slane %v1505_v30, 4  ;;  %v1513_v16 = vsel %vm839_vm3, %v1446_v34, 0.0  ;;  %v1512_v48 = vsel %vm839_vm3, %v1445_v35, 0.0  ;;  %v1174_v42 = vmax.f32 %v1068_v39, 0.0  ;;  %v2070_v50 = vpop.f32.mrb[14].mxu1 }
 0x1e6   : > { %v1173_v49 = vmax.f32 %v1063_v40, 0.0  ;;  %v1493_v33 = vadd.f32 %v1492_v43, %v1491_v6  ;;  %v1500_v14 = vadd.f32 %v1499_v44, %v1498_v27  ;;  %v1514_v31 = vadd.f32 %v1513_v16, %v1512_v48  ;;  %v1072_v38 = vpop.f32.mrb[15].mxu1 }
 0x1e7   : > { %v1507_v55 = vadd.f32 %v1506_v45, %v1505_v30  ;;  %1206 = vst.msk [vmem:[%s2568_s14 + $0x68] sm:$0xff] %vm839_vm3, %v1174_v42  ;;  %v1448_v59 = vmul.f32 %v2619_v62, %v1174_v42  ;;  %v1078_v51 = vadd.f32 %v2070_v50, %v2558_v15  ;;  %v1073_v2 = vadd.f32 %v2558_v15, %v1072_v38 }
 0x1e8   : > { %1205 = vst.msk [vmem:[%s2568_s14 + $0x60] sm:$0xff] %vm839_vm3, %v1173_v49  ;;  %v1447_v63 = vmul.f32 %v2659_v12, %v1173_v49  ;;  %v1630_v3 = vsel %vm1629_vm5, %v1493_v33, %v1628_v41  ;;  %v1501_v4 = vrot.slane %v1500_v14, 1  ;;  %v1515_v11 = vrot.slane %v1514_v31, 4 }
 0x1e9   : > { %v1508_v5 = vrot.slane %v1507_v55, 2  ;;  %v1522_v7 = vsel %vm839_vm3, %v1448_v59, 0.0  ;;  %v1176_v13 = vmax.f32 %v1078_v51, 0.0  ;;  %v1175_v17 = vmax.f32 %v1073_v2, 0.0  ;;  %v2073_v19 = vpop.f32.mrb[16].mxu1 }
 0x1ea   : > { %v1521_v62 = vsel %vm839_vm3, %v1447_v63, 0.0  ;;  %v1502_v12 = vadd.f32 %v1501_v4, %v1500_v14  ;;  %v1516_v18 = vadd.f32 %v1515_v11, %v1514_v31  ;;  %v1082_v22 = vpop.f32.mrb[17].mxu1  ;;  %v1088_v36 = vadd.f32 %v2073_v19, %v2558_v15 }
 0x1eb   : > { %v1509_v20 = vadd.f32 %v1508_v5, %v1507_v55  ;;  %v1523_v21 = vadd.f32 %v1522_v7, %v1521_v62  ;;  %1208 = vst.msk [vmem:[%s2568_s14 + $0x78] sm:$0xff] %vm839_vm3, %v1176_v13  ;;  %v1450_v24 = vmul.f32 %v2630_v9, %v1176_v13  ;;  %1207 = vst.msk [vmem:[%s2568_s14 + $0x70] sm:$0xff] %vm839_vm3, %v1175_v17 }
 0x1ec   : > { %v1449_v25 = vmul.f32 %v2671_v0, %v1175_v17  ;;  %v1083_v26 = vadd.f32 %v2558_v15, %v1082_v22  ;;  %v1632_v29 = vsel %vm1631_vm6, %v1502_v12, %v1630_v3  ;;  %v1517_v27 = vrot.slane %v1516_v18, 2 }
 0x1ed   : > { %v1510_v6 = vrot.slane %v1509_v20, 1  ;;  %v1524_v30 = vrot.slane %v1523_v21, 4  ;;  %v1531_v54 = vsel %vm839_vm3, %v1450_v24, 0.0  ;;  %v1178_v9 = vmax.f32 %v1088_v36, 0.0  ;;  %v2076_v39 = vpop.f32.mrb[18].mxu1 }
 0x1ee   : > { %v1530_v34 = vsel %vm839_vm3, %v1449_v25, 0.0  ;;  %v1177_v35 = vmax.f32 %v1083_v26, 0.0  ;;  %v1518_v40 = vadd.f32 %v1517_v27, %v1516_v18  ;;  %v1092_v44 = vpop.f32.mrb[19].mxu1  ;;  %v1098_v48 = vadd.f32 %v2076_v39, %v2558_v15 }
 0x1ef   : > { %v1511_v0 = vadd.f32 %v1510_v6, %v1509_v20  ;;  %v1525_v41 = vadd.f32 %v1524_v30, %v1523_v21  ;;  %v1532_v43 = vadd.f32 %v1531_v54, %v1530_v34  ;;  %1210 = vst.msk [vmem:[%s2568_s14 + $0x88] sm:$0xff] %vm839_vm3, %v1178_v9  ;;  %v1452_v45 = vmul.f32 %v2543_v56, %v1178_v9 }
 0x1f0   : > { %1209 = vst.msk [vmem:[%s2568_s14 + $0x80] sm:$0xff] %vm839_vm3, %v1177_v35  ;;  %v1451_v16 = vmul.f32 %v2538_v53, %v1177_v35  ;;  %v1093_v42 = vadd.f32 %v2558_v15, %v1092_v44  ;;  %v1519_v50 = vrot.slane %v1518_v40, 1  ;;  %v1180_v56 = vmax.f32 %v1098_v48, 0.0 }
 0x1f1   : > { %v1634_v49 = vsel %vm1633_vm7, %v1511_v0, %v1632_v29  ;;  %v1526_v33 = vrot.slane %v1525_v41, 2  ;;  %v1533_v14 = vrot.slane %v1532_v43, 4  ;;  %v1540_v55 = vsel %vm839_vm3, %v1452_v45, 0.0  ;;  %v2079_v59 = vpop.f32.mrb[20].mxu1 }
 0x1f2   : > { %v1539_v31 = vsel %vm839_vm3, %v1451_v16, 0.0  ;;  %v1179_v38 = vmax.f32 %v1093_v42, 0.0  ;;  %v1520_v53 = vadd.f32 %v1519_v50, %v1518_v40  ;;  %v1102_v3 = vpop.f32.mrb[21].mxu1  ;;  %1212 = vst.msk [vmem:[%s2568_s14 + $0x98] sm:$0xff] %vm839_vm3, %v1180_v56  ;;  %v1454_v4 = vmul.f32 %v2549_v60, %v1180_v56  ;;  %v1398_v16 = vpop.permute.xlu1 %1397 }
 0x1f3   : > { %v1527_v63 = vadd.f32 %v1526_v33, %v1525_v41  ;;  %v1534_v51 = vadd.f32 %v1533_v14, %v1532_v43  ;;  %v1541_v2 = vadd.f32 %v1540_v55, %v1539_v31  ;;  %v1108_v11 = vadd.f32 %v2079_v59, %v2558_v15 }
 0x1f4   : > { %1211 = vst.msk [vmem:[%s2568_s14 + $0x90] sm:$0xff] %vm839_vm3, %v1179_v38  ;;  %v1453_v5 = vmul.f32 %v2546_v58, %v1179_v38  ;;  %v1103_v7 = vadd.f32 %v2558_v15, %v1102_v3  ;;  %v1636_v62 = vsel %vm1635_vm8, %v1520_v53, %v1634_v49  ;;  %v1549_v12 = vsel %vm839_vm3, %v1454_v4, 0.0 }
 0x1f5   : > { %v1528_v13 = vrot.slane %v1527_v63, 1  ;;  %v1535_v17 = vrot.slane %v1534_v51, 2  ;;  %v1542_v19 = vrot.slane %v1541_v2, 4  ;;  %v1182_v20 = vmax.f32 %v1108_v11, 0.0  ;;  %v2082_v58 = vpop.f32.mrb[22].mxu1 }
 0x1f6   : > { %v1548_v60 = vsel %vm839_vm3, %v1453_v5, 0.0  ;;  %v1181_v18 = vmax.f32 %v1103_v7, 0.0  ;;  %v1112_v36 = vpop.f32.mrb[23].mxu1  ;;  %v1118_v6 = vadd.f32 %v2082_v58, %v2558_v15 }
 0x1f7   : > { %v1529_v21 = vadd.f32 %v1528_v13, %v1527_v63  ;;  %v1536_v22 = vadd.f32 %v1535_v17, %v1534_v51  ;;  %v1543_v24 = vadd.f32 %v1542_v19, %v1541_v2  ;;  %v1550_v25 = vadd.f32 %v1549_v12, %v1548_v60  ;;  %1214 = vst.msk [vmem:[%s2568_s14 + $0xa8] sm:$0xff] %vm839_vm3, %v1182_v20 }
 0x1f8   : > { %v1456_v26 = vmul.f32 %v2577_v28, %v1182_v20  ;;  %1213 = vst.msk [vmem:[%s2568_s14 + $0xa0] sm:$0xff] %vm839_vm3, %v1181_v18  ;;  %v1455_v29 = vmul.f32 %v2605_v46, %v1181_v18  ;;  %v1113_v27 = vadd.f32 %v2558_v15, %v1112_v36  ;;  %v1184_v39 = vmax.f32 %v1118_v6, 0.0 }
 0x1f9   : > { %v1537_v30 = vrot.slane %v1536_v22, 1  ;;  %v1544_v54 = vrot.slane %v1543_v24, 2  ;;  %v1551_v34 = vrot.slane %v1550_v25, 4  ;;  %v1638_v9 = vsel %vm1637_vm9, %v1529_v21, %v1636_v62  ;;  %v2085_v0 = vpop.f32.mrb[24].mxu1 }
 0x1fa   : > { %v1558_v28 = vsel %vm839_vm3, %v1456_v26, 0.0  ;;  %v1557_v35 = vsel %vm839_vm3, %v1455_v29, 0.0  ;;  %v1183_v46 = vmax.f32 %v1113_v27, 0.0  ;;  %v1122_v45 = vpop.f32.mrb[25].mxu1  ;;  %1216 = vst.msk [vmem:[%s2568_s14 + $0xb8] sm:$0xff] %vm839_vm3, %v1184_v39  ;;  %v1458_v48 = vmul.f32 %v2583_v32, %v1184_v39 }
 0x1fb   : > { %v1538_v40 = vadd.f32 %v1537_v30, %v1536_v22  ;;  %v1545_v41 = vadd.f32 %v1544_v54, %v1543_v24  ;;  %v1552_v43 = vadd.f32 %v1551_v34, %v1550_v25  ;;  %v1559_v44 = vadd.f32 %v1558_v28, %v1557_v35 }
 0x1fc   : > { %1215 = vst.msk [vmem:[%s2568_s14 + $0xb0] sm:$0xff] %vm839_vm3, %v1183_v46  ;;  %v1457_v42 = vmul.f32 %v2616_v61, %v1183_v46  ;;  %v1128_v49 = vadd.f32 %v2085_v0, %v2558_v15  ;;  %v1123_v50 = vadd.f32 %v2558_v15, %v1122_v45  ;;  %v1567_v56 = vsel %vm839_vm3, %v1458_v48, 0.0 }
 0x1fd   : > { %v1546_v33 = vrot.slane %v1545_v41, 1  ;;  %v1553_v14 = vrot.slane %v1552_v43, 2  ;;  %v1560_v55 = vrot.slane %v1559_v44, 4  ;;  %v1640_v31 = vsel %vm1639_vm10, %v1538_v40, %v1638_v9  ;;  %v2088_v53 = vpop.f32.mrb[26].mxu1 }
 0x1fe   : > { %v1566_v38 = vsel %vm839_vm3, %v1457_v42, 0.0  ;;  %v1186_v32 = vmax.f32 %v1128_v49, 0.0  ;;  %v1185_v59 = vmax.f32 %v1123_v50, 0.0  ;;  %1650 = vst.msk [vmem:[%s2764_s16] sm:$0xff] %vm839_vm3, %v1640_v31  ;;  %v2769_v61 = vmul.f32 %v1398_v16, %v2535_v52  ;;  %v1132_v3 = vpop.f32.mrb[27].mxu1 }
 0x1ff   : > { %v1554_v63 = vadd.f32 %v1553_v14, %v1552_v43  ;;  %v1561_v51 = vadd.f32 %v1560_v55, %v1559_v44  ;;  %v1568_v2 = vadd.f32 %v1567_v56, %v1566_v38  ;;  %v1138_v11 = vadd.f32 %v2088_v53, %v2558_v15 }
 0x200   : > { %1218 = vst.msk [vmem:[%s2568_s14 + $0xc8] sm:$0xff] %vm839_vm3, %v1186_v32  ;;  %v1460_v4 = vmul.f32 %v2592_v37, %v1186_v32  ;;  %1217 = vst.msk [vmem:[%s2568_s14 + $0xc0] sm:$0xff] %vm839_vm3, %v1185_v59  ;;  %v1459_v5 = vmul.f32 %v2638_v23, %v1185_v59  ;;  %v1133_v7 = vadd.f32 %v2558_v15, %v1132_v3 }
 0x201   : > { %v1547_v62 = vadd.f32 %v1546_v33, %v1545_v41  ;;  %v1555_v52 = vrot.slane %v1554_v63, 1  ;;  %v1562_v13 = vrot.slane %v1561_v51, 2  ;;  %v1569_v17 = vrot.slane %v1568_v2, 4  ;;  %v2091_v20 = vpop.f32.mrb[28].mxu1 }
 0x202   : > { %v1576_v19 = vsel %vm839_vm3, %v1460_v4, 0.0  ;;  %v1575_v12 = vsel %vm839_vm3, %v1459_v5, 0.0  ;;  %v1188_v60 = vmax.f32 %v1138_v11, 0.0  ;;  %v1187_v37 = vmax.f32 %v1133_v7, 0.0  ;;  %v1142_v22 = vpop.f32.mrb[29].mxu1 }
 0x203   : > { %v1556_v18 = vadd.f32 %v1555_v52, %v1554_v63  ;;  %v1563_v58 = vadd.f32 %v1562_v13, %v1561_v51  ;;  %v1570_v23 = vadd.f32 %v1569_v17, %v1568_v2  ;;  %v1577_v21 = vadd.f32 %v1576_v19, %v1575_v12 }
 0x204   : > { %1220 = vst.msk [vmem:[%s2568_s14 + $0xd8] sm:$0xff] %vm839_vm3, %v1188_v60  ;;  %v1462_v24 = vmul.f32 %v2608_v47, %v1188_v60  ;;  %1219 = vst.msk [vmem:[%s2568_s14 + $0xd0] sm:$0xff] %vm839_vm3, %v1187_v37  ;;  %v1461_v25 = vmul.f32 %v2651_v10, %v1187_v37  ;;  %v1148_v36 = vadd.f32 %v2091_v20, %v2558_v15 }
 0x205   : > { %v1143_v26 = vadd.f32 %v2558_v15, %v1142_v22  ;;  %v1641_v29 = vsel %vm1627_vm4, %v1556_v18, %v1547_v62  ;;  %v1564_v6 = vrot.slane %v1563_v58, 1  ;;  %v1571_v27 = vrot.slane %v1570_v23, 2  ;;  %v2094_v28 = vpop.f32.mrb[30].mxu1 }
 0x206   : > { %v1578_v30 = vrot.slane %v1577_v21, 4  ;;  %v1585_v54 = vsel %vm839_vm3, %v1462_v24, 0.0  ;;  %v1584_v34 = vsel %vm839_vm3, %v1461_v25, 0.0  ;;  %v1190_v47 = vmax.f32 %v1148_v36, 0.0  ;;  %v1152_v0 = vpop.f32.mrb[31].mxu1 }
 0x207   : > { %v1189_v9 = vmax.f32 %v1143_v26, 0.0  ;;  %v1565_v35 = vadd.f32 %v1564_v6, %v1563_v58  ;;  %v1572_v10 = vadd.f32 %v1571_v27, %v1570_v23  ;;  %v1586_v46 = vadd.f32 %v1585_v54, %v1584_v34 }
 0x208   : > { %v1579_v39 = vadd.f32 %v1578_v30, %v1577_v21  ;;  %1222 = vst.msk [vmem:[%s2568_s14 + $0xe8] sm:$0xff] %vm839_vm3, %v1190_v47  ;;  %v1464_v40 = vmul.f32 %v2625_v1, %v1190_v47  ;;  %v1158_v43 = vadd.f32 %v2094_v28, %v2558_v15  ;;  %v1153_v44 = vadd.f32 %v2558_v15, %v1152_v0 }
 0x209   : > { %1221 = vst.msk [vmem:[%s2568_s14 + $0xe0] sm:$0xff] %vm839_vm3, %v1189_v9  ;;  %v1463_v41 = vmul.f32 %v2667_v57, %v1189_v9  ;;  %v1642_v45 = vsel %vm1629_vm5, %v1565_v35, %v1641_v29  ;;  %v1573_v16 = vrot.slane %v1572_v10, 1  ;;  %v1587_v42 = vrot.slane %v1586_v46, 4 }
 0x20a   : > { %v1580_v48 = vrot.slane %v1579_v39, 2  ;;  %v1594_v49 = vsel %vm839_vm3, %v1464_v40, 0.0  ;;  %v1192_v1 = vmax.f32 %v1158_v43, 0.0  ;;  %v1191_v33 = vmax.f32 %v1153_v44, 0.0 }
 0x20b   : > { %v1593_v50 = vsel %vm839_vm3, %v1463_v41, 0.0  ;;  %v1574_v14 = vadd.f32 %v1573_v16, %v1572_v10  ;;  %v1588_v31 = vadd.f32 %v1587_v42, %v1586_v46 }
 0x20c   : > { %v1581_v55 = vadd.f32 %v1580_v48, %v1579_v39  ;;  %v1595_v57 = vadd.f32 %v1594_v49, %v1593_v50  ;;  %1224 = vst.msk [vmem:[%s2568_s14 + $0xf8] sm:$0xff] %vm839_vm3, %v1192_v1  ;;  %v1466_v56 = vmul.f32 %v2641_v8, %v1192_v1  ;;  %1223 = vst.msk [vmem:[%s2568_s14 + $0xf0] sm:$0xff] %vm839_vm3, %v1191_v33  ;;  %s2174_s14 = scalar_lea.vmem %s2173_s26, 512 }
 0x20d   : > { %v1465_v15 = vmul.f32 %v2769_v61, %v1191_v33  ;;  %v1643_v38 = vsel %vm1631_vm6, %v1574_v14, %v1642_v45  ;;  %v1589_v59 = vrot.slane %v1588_v31, 2  ;;  %p2176_p2 = scmp.lt.s32.totalorder %s2174_s14, %s2168_s24 }
 0x20e   : > { %v1582_v32 = vrot.slane %v1581_v55, 1  ;;  %v1596_v53 = vrot.slane %v1595_v57, 4  ;;  %v1603_v63 = vsel %vm839_vm3, %v1466_v56, 0.0 }
 0x20f   : > { %v1602_v51 = vsel %vm839_vm3, %v1465_v15, 0.0  ;;  %v1590_v3 = vadd.f32 %v1589_v59, %v1588_v31  ;;  %p2177_p3 = por %p2176_p2, %p2175_p1 }
 0x210   : > { %v1583_v2 = vadd.f32 %v1582_v32, %v1581_v55  ;;  %v1597_v4 = vadd.f32 %v1596_v53, %v1595_v57  ;;  %v1604_v5 = vadd.f32 %v1603_v63, %v1602_v51 }
 0x211   : > { %v1591_v11 = vrot.slane %v1590_v3, 1  ;;  %p2178_p5 = pnand %p2177_p3, %p2171_p0 }
 0x212   : > { %v1644_v8 = vsel %vm1633_vm7, %v1583_v2, %v1643_v38  ;;  %v1598_v7 = vrot.slane %v1597_v4, 2  ;;  %v1605_v61 = vrot.slane %v1604_v5, 4 }
 0x213   : > { %v1592_v62 = vadd.f32 %v1591_v11, %v1590_v3 }
 0x214   : > { %v1599_v52 = vadd.f32 %v1598_v7, %v1597_v4  ;;  %v1606_v13 = vadd.f32 %v1605_v61, %v1604_v5 }
 0x215   : > { %v1645_v17 = vsel %vm1635_vm8, %v1592_v62, %v1644_v8 }
 0x216   : > { %v1600_v19 = vrot.slane %v1599_v52, 1  ;;  %v1607_v12 = vrot.slane %v1606_v13, 2 }
 0x218   : > { %v1601_v60 = vadd.f32 %v1600_v19, %v1599_v52  ;;  %v1608_v37 = vadd.f32 %v1607_v12, %v1606_v13 }
 0x21a   : > { %v1609_v20 = vrot.slane %v1608_v37, 1  ;;  %v1646_v18 = vsel %vm1637_vm9, %v1601_v60, %v1645_v17 }
 0x21c   : > { %v1610_v58 = vadd.f32 %v1609_v20, %v1608_v37 }
 0x21e   : > { %v1647_v23 = vsel %vm1639_vm10, %v1610_v58, %v1646_v18 }
 0x21f   : > { %1651 = vst.msk [vmem:[%s2764_s16 + $0x8] sm:$0xff] %vm839_vm3, %v1647_v23 }
 0x220   : > { %2181 = shalt.err (!%p2178_p5)
}
 0x221   : > { %s2182_s11 = scalar_lea.hbm %s2820_s20, 256  ;;  %s2186_s19 = scalar_lea.hbm %s2883_s8, 512 }
 0x222   : > { %p2183_p6 = scmp.ne.s32.totalorder %s2820_s20, %s2182_s11  ;;  %p2187_p10 = scmp.lt.u32.totalorder %s2820_s20, %s2883_s8 }
 0x223   : > { %p2188_p11 = scmp.lt.u32.totalorder %s2186_s19, %s2182_s11  ;;  %p2190_p13 = scmp.lt.u32.totalorder %s2182_s11, %s2820_s20 }
 0x224   : > { %p2184_p7 = pnand %p2183_p6, %p2336_p4 }
 0x225   : > { %p2189_p12 = por %p2188_p11, %p2187_p10 }
 0x226   : > { %p2185_p9 = pneg %p2184_p7 }
 0x227   : > { %p2191_p0 = por %p2190_p13, %p2189_p12 }
 0x229   : > { %p2192_p1 = pnand %p2191_p0, %p2185_p9 }
 0x22b   : > { %2195 = shalt.err (!%p2192_p1)
}
 0x22c   : > { %s2249_s24 = smov 128   ;;  %s2250_s25 = smov 8  }
 0x22d   : > { %2107 = dma.vmem_to_hbm [thread:$0]  (%p2336_p4), %s2822_s21, 256, %s2820_s20, %s2829_s30, %s2249_s24, %s2249_s24, %s2250_s25  }
 0x22e PF: > { %p2113_p2 = scmp.ge.s32.totalorder %s2246_s10, 2  ;;  %s1708_s26 = sand.u32 1, %s2226_s27  }
 0x22f   : > { %s1709_s14 = scalar_lea.sflag [#allocation3], %s1708_s26 }
 0x230   : > { %p2110_p3 = pnand %p2113_p2, %p2343_p8 }
 0x232   : > { %2221 = dma.done.wait (!%p2110_p3), %s1709_s14, 256  }
 0x233   : > { %2223 = vsyncadd (!%p2110_p3), %s1709_s14, 4294967040  ;;  %s22_s10 = sadd.s32 1, %s2246_s10   ;;  %s2886_s27 = smov %s2230_s28 }
 0x234   : > { %p19_p5 = scmp.ge.s32.totalorder %s22_s10, 4   ;;  %s2887_s28 = smov %s2234_s29 }
 0x235   : > { %s2888_s29 = smov %s2349_s18  ;;  %s2889_s30 = smov %s2242_s9 }
 0x236   : > { %s2890_s9 = smov %s2892_s13  ;;  %21 = sbr.rel (!%p19_p5) target bundleno = 4 (0x4), region = 101 }
 0x23d   :  { %1714 = vsyncpa [#allocation3], 1 }
 0x23e   :  { %1716 = vsyncpa [#allocation3 + $0x1], 1 }

</bundles_post_ra>
